<compile_context>
chip_gen: v6e
topology: v6e:2x2x1
jax: 0.10.0
libtpu: 0.0.40
codegen_flags: <defaults>
</compile_context>

<pallas_src>
import math

import jax
import jax.numpy as jnp
from jax.experimental import pallas as pl
from jax.experimental.pallas import tpu as pltpu


# ----------------------------------------------------------------------------
# Helpers
# ----------------------------------------------------------------------------
def _round_up(x, m):
    return ((x + m - 1) // m) * m


def _pad_cast(a, shape, dtype):
    """Cast `a` to `dtype` and crop/zero-pad to `shape` (no-op if already matching)."""
    dtype = jnp.dtype(dtype)
    shape = tuple(shape)
    if a.dtype != dtype:
        a = a.astype(dtype)
    if a.shape == shape:
        return a
    a = a[tuple(slice(0, min(s, d)) for d, s in zip(a.shape, shape))]
    if a.shape == shape:
        return a
    out = jnp.zeros(shape, dtype)
    return out.at[tuple(slice(0, d) for d in a.shape)].set(a)


def _gcn_tiles(n, tm, tk):
    """Row/col tile sizes for the N x N adj contraction."""
    n8 = _round_up(max(n, 8), 8)
    n128 = _round_up(max(n, 128), 128)
    # Row (M) tiles: multiple of 8. Prefer >= 2 tiles so the "parallel" M axis
    # can be sharded across v7x's two TensorCores (no-op on v5e/v6e).
    nt_m = max(1, -(-n8 // tm))
    if nt_m == 1 and n8 > 8:
        nt_m = 2
    tm = _round_up(-(-n8 // nt_m), 8)
    # Column (K) tiles: multiple of 128 (lane dim of adj tiles).
    nt_k = max(1, -(-n128 // tk))
    tk = _round_up(-(-n128 // nt_k), 128)
    return tm, tk


def _plan(n, f_in, f_out, *, tm, tk, compute_dtype, out_dtype, vmem_limit_bytes):
    """Shared tiling/padding plan used by graph_convolution and prepare_adj."""
    f_in_p = _round_up(f_in, 128)
    f_out_p = _round_up(f_out, 128)
    reassociate = f_out > f_in            # run the N^2 contraction on the narrower width
    acc_w = f_in_p if reassociate else f_out_p
    tm, tk = _gcn_tiles(n, tm, tk)

    asize = jnp.dtype(compute_dtype).itemsize
    osize = jnp.dtype(out_dtype).itemsize

    def footprint(tm_, tk_):
        return (2 * tm_ * tk_ * asize          # adj tile (double buffered)
                + 2 * tk_ * f_in_p * asize     # x row tile (double buffered)
                + f_in_p * f_out_p * asize     # W, resident
                + 2 * tm_ * f_out_p * osize    # out tile (double buffered)
                + tm_ * acc_w * 4              # f32 accumulator
                + f_out_p * 4)                 # bias

    budget = int(vmem_limit_bytes * 0.85)
    while footprint(tm, tk) > budget and tk > 128:
        tk = max(128, _round_up(tk // 2, 128))
    while footprint(tm, tk) > budget and tm > 8:
        tm = max(8, _round_up(tm // 2, 8))

    Mp = _round_up(max(n, 8), tm)
    Kp = _round_up(max(n, 128), tk)
    return dict(tm=tm, tk=tk, Mp=Mp, Kp=Kp, f_in_p=f_in_p, f_out_p=f_out_p,
                reassociate=reassociate, acc_w=acc_w)


def prepare_adj(adj, in_features, out_features, *, num_nodes=None,
                compute_dtype=jnp.bfloat16, tm=512, tk=1024,
                vmem_limit_bytes=48 * 1024 * 1024):
    """Hoist the O(N^2) adj bf16 cast + zero-pad out of the per-layer call."""
    n = int(num_nodes) if num_nodes is not None else int(adj.shape[0])
    p = _plan(n, in_features, out_features, tm=tm, tk=tk,
              compute_dtype=compute_dtype, out_dtype=jnp.float32,
              vmem_limit_bytes=vmem_limit_bytes)
    return _pad_cast(adj, (p["Mp"], p["Kp"]), compute_dtype)


# ----------------------------------------------------------------------------
# Fused GCN kernel
# ----------------------------------------------------------------------------
def _make_gcn_kernel(reassociate: bool, has_bias: bool, multi_k: bool):
    """Kernel for out[i] = sum_k adj[i,k] @ (X[k] @ W)  (+ bias).

    reassociate=True computes sum_k adj[i,k] @ X[k] and applies W in the
    epilogue instead (used when F_out > F_in).
    multi_k=False skips the f32 accumulator scratch (K grid == 1).
    """
    def kernel(*refs):
        if has_bias:
            adj_ref, x_ref, w_ref, b_ref = refs[:4]
            rest = refs[4:]
        else:
            adj_ref, x_ref, w_ref = refs[:3]
            b_ref = None
            rest = refs[3:]
        if multi_k:
            o_ref, acc_ref = rest
        else:
            (o_ref,) = rest
            acc_ref = None

        def finalize(acc_f32):
            if reassociate:
                out = jnp.dot(acc_f32.astype(w_ref.dtype), w_ref[...],
                              preferred_element_type=jnp.float32)
            else:
                out = acc_f32
            if has_bias:
                out = out + b_ref[...]
            o_ref[...] = out.astype(o_ref.dtype)

        if reassociate:
            step = jnp.dot(adj_ref[...], x_ref[...],
                           preferred_element_type=jnp.float32)
        else:
            s = jnp.dot(x_ref[...], w_ref[...],
                        preferred_element_type=jnp.float32)
            step = jnp.dot(adj_ref[...], s.astype(x_ref.dtype),
                           preferred_element_type=jnp.float32)

        if not multi_k:
            finalize(step)
        else:
            k = pl.program_id(1)

            @pl.when(k == 0)
            def _():
                acc_ref[...] = jnp.zeros_like(acc_ref)

            acc_ref[...] += step

            @pl.when(k == pl.num_programs(1) - 1)
            def _():
                finalize(acc_ref[...])

    return kernel


def graph_convolution(x, adj, weight, bias=None, *, num_nodes=None, trim=True,
                      out_dtype=None, compute_dtype=jnp.bfloat16,
                      tm=512, tk=1024, vmem_limit_bytes=48 * 1024 * 1024):
    """Fused GCN layer forward: adj @ (x @ weight) (+ bias) in ONE pallas_call.

    x:      [N, F_in] (or padded [Kp, F_in_p] panel from a previous layer)
    adj:    [N, N] dense (or pre-padded/cast via prepare_adj)
    weight: [F_in, F_out],  bias: [F_out] or None
    trim=False returns the padded [Mp, F_out_p] panel (chain into next layer).
    """
    f_in, f_out = weight.shape
    n = int(num_nodes) if num_nodes is not None else int(x.shape[0])
    if out_dtype is None:
        out_dtype = x.dtype

    p = _plan(n, f_in, f_out, tm=tm, tk=tk, compute_dtype=compute_dtype,
              out_dtype=out_dtype, vmem_limit_bytes=vmem_limit_bytes)
    tm, tk = p["tm"], p["tk"]
    Mp, Kp = p["Mp"], p["Kp"]
    f_in_p, f_out_p = p["f_in_p"], p["f_out_p"]
    reassociate, acc_w = p["reassociate"], p["acc_w"]

    # Cast/pad operands; these are Python-level no-ops when inputs already
    # match (pre-padded adj, padded bf16 output of a previous layer).
    adj_p = _pad_cast(adj, (Mp, Kp), compute_dtype)
    x_p = _pad_cast(x, (Kp, f_in_p), compute_dtype)
    w_p = _pad_cast(weight, (f_in_p, f_out_p), compute_dtype)

    has_bias = bias is not None
    grid_m, grid_k = Mp // tm, Kp // tk
    multi_k = grid_k > 1

    in_specs = [
        pl.BlockSpec((tm, tk), lambda i, k: (i, k)),            # adj tile
        pl.BlockSpec((tk, f_in_p), lambda i, k: (k, 0)),        # x row tile
        pl.BlockSpec((f_in_p, f_out_p), lambda i, k: (0, 0)),   # W (VMEM-resident)
    ]
    operands = [adj_p, x_p, w_p]
    if has_bias:
        in_specs.append(pl.BlockSpec((1, f_out_p), lambda i, k: (0, 0)))
        operands.append(_pad_cast(jnp.asarray(bias).reshape(1, -1),
                                  (1, f_out_p), jnp.float32))

    scratch_shapes = [pltpu.VMEM((tm, acc_w), jnp.float32)] if multi_k else []

    asize = jnp.dtype(compute_dtype).itemsize
    osize = jnp.dtype(out_dtype).itemsize
    flops = 2 * Mp * Kp * (f_in_p if reassociate else f_out_p)
    flops += (2 * Mp * f_in_p * f_out_p if reassociate
              else 2 * grid_m * Kp * f_in_p * f_out_p)
    bytes_accessed = (Mp * Kp * asize                 # adj streamed once
                      + grid_m * Kp * f_in_p * asize  # x re-streamed per row tile
                      + f_in_p * f_out_p * asize
                      + Mp * f_out_p * osize
                      + (f_out_p * 4 if has_bias else 0))
    cost = pl.CostEstimate(flops=flops, transcendentals=0,
                           bytes_accessed=bytes_accessed)

    out_p = pl.pallas_call(
        _make_gcn_kernel(reassociate, has_bias, multi_k),
        out_shape=jax.ShapeDtypeStruct((Mp, f_out_p), out_dtype),
        grid_spec=pltpu.PrefetchScalarGridSpec(
            num_scalar_prefetch=0,
            grid=(grid_m, grid_k),
            in_specs=in_specs,
            out_specs=pl.BlockSpec((tm, f_out_p), lambda i, k: (i, 0)),
            scratch_shapes=scratch_shapes,
        ),
        compiler_params=pltpu.CompilerParams(
            dimension_semantics=("parallel", "arbitrary"),
            vmem_limit_bytes=vmem_limit_bytes,
        ),
        cost_estimate=cost,
    )(*operands)

    if trim:
        return out_p[:n, :f_out]
    return out_p


# ----------------------------------------------------------------------------
# Reference + parameter init (mirrors the PyTorch module)
# ----------------------------------------------------------------------------
def gcn_reference(x, adj, weight, bias, compute_dtype=jnp.bfloat16):
    """Pure-JAX reference mirroring the kernel's bf16-operand / f32-accumulate flow."""
    f32 = jnp.float32
    c = lambda a: a.astype(compute_dtype).astype(f32)
    f_in, f_out = weight.shape
    if f_out > f_in:
        ax = jnp.dot(c(adj), c(x))
        out = jnp.dot(c(ax), c(weight))
    else:
        support = jnp.dot(c(x), c(weight))
        out = jnp.dot(c(adj), c(support))
    if bias is not None:
        out = out + bias.astype(f32)[None, :]
    return out


def init_gcn_params(key, in_features, out_features, bias=True, dtype=jnp.float32):
    """Deterministic re-implementation of GraphConvolution.reset_parameters()."""
    stdv = 1.0 / math.sqrt(out_features)
    kw, kb = jax.random.split(key)
    weight = jax.random.uniform(
        kw, (in_features, out_features), dtype=dtype, minval=-stdv, maxval=stdv
    )
    b = (
        jax.random.uniform(kb, (out_features,), dtype=dtype, minval=-stdv, maxval=stdv)
        if bias
        else None
    )
    return weight, b


if __name__ == "__main__":
    key = jax.random.PRNGKey(0)
    k_x, k_adj, k_p1, k_p2 = jax.random.split(key, 4)

    # Small synthetic graph, but large enough to exercise the tiled grid:
    # 512 nodes, 96 -> 64 features (layer 1, bias), then 64 -> 96 (layer 2, no bias).
    N, F_IN, F_HID, F_OUT2 = 512, 96, 64, 96
    x = jax.random.normal(k_x, (N, F_IN), dtype=jnp.float32)

    # Sparse-ish row-normalized adjacency with self loops (evaluated densely).
    a_raw = (jax.random.uniform(k_adj, (N, N)) > 0.99).astype(jnp.float32)
    adj = a_raw + jnp.eye(N, dtype=jnp.float32)
    adj = adj / jnp.sum(adj, axis=1, keepdims=True)

    w1, b1 = init_gcn_params(k_p1, F_IN, F_HID, bias=True)
    w2, b2 = init_gcn_params(k_p2, F_HID, F_OUT2, bias=False)

    # Hoist the O(N^2) adj bf16 cast + zero-pad once for the whole forward.
    adj_p = prepare_adj(adj, F_IN, F_HID, num_nodes=N)

    # Layer 1: F_out <= F_in (fused adj @ (X@W)), with bias. tk=256 forces a
    # multi-step K reduction through the f32 VMEM accumulator. Keep the padded
    # bf16 panel as output (no slice / re-pad before layer 2).
    out1_p = graph_convolution(x, adj_p, w1, b1, num_nodes=N, trim=False,
                               out_dtype=jnp.bfloat16, tk=256)
    out1_p = jax.block_until_ready(out1_p)
    out1 = out1_p[:N, :F_HID].astype(jnp.float32)
    ref1 = gcn_reference(x, adj, w1, b1)
    assert out1.shape == (N, F_HID)
    assert jnp.allclose(out1, ref1, atol=2e-2, rtol=2e-2), \
        float(jnp.max(jnp.abs(out1 - ref1)))

    # Layer 2: F_out > F_in (fused (adj@X) @ W epilogue), no bias, single-K grid
    # (no accumulator scratch). Consumes the padded bf16 panel directly.
    out2 = graph_convolution(out1_p, adj_p, w2, b2, num_nodes=N, trim=True,
                             out_dtype=jnp.float32)
    out2 = jax.block_until_ready(out2)
    ref2 = gcn_reference(out1, adj, w2, b2)
    assert out2.shape == (N, F_OUT2)
    assert jnp.allclose(out2, ref2, atol=2e-2, rtol=2e-2), \
        float(jnp.max(jnp.abs(out2 - ref2)))

    print("KERNEL_OK")
</pallas_src>

<mosaic_0001>
module attributes {stable_mosaic.version = 11 : i64} {
  func.func @kernel(%arg0: i32, %arg1: i32, %arg2: memref<256x256xbf16, #tpu.memory_space<vmem>>, %arg3: memref<256x128xbf16, #tpu.memory_space<vmem>>, %arg4: memref<128x128xbf16, #tpu.memory_space<vmem>>, %arg5: memref<1x128xf32, #tpu.memory_space<vmem>>, %arg6: memref<256x128xbf16, #tpu.memory_space<vmem>>, %arg7: memref<256x128xf32, #tpu.memory_space<vmem>>) attributes {dimension_semantics = [#tpu.dimension_semantics<parallel>, #tpu.dimension_semantics<arbitrary>], iteration_bounds = array<i64: 2, 2>, scalar_prefetch = 0 : i64, scratch_operands = 1 : i64, tpu.core_type = #tpu.core_type<tc>, window_params = [{transform_indices = @transform_0, window_bounds = array<i64: 256, 256>}, {transform_indices = @transform_1, window_bounds = array<i64: 256, 128>}, {pipeline_mode = #tpu.pipeline_mode<synchronous>, transform_indices = @transform_2, window_bounds = array<i64: 128, 128>}, {pipeline_mode = #tpu.pipeline_mode<synchronous>, transform_indices = @transform_3, window_bounds = array<i64: 1, 128>}, {transform_indices = @transform_4, window_bounds = array<i64: 256, 128>}]} {
    %c0 = arith.constant 0 : index
    %c0_0 = arith.constant 0 : index
    %0 = vector.load %arg3[%c0, %c0_0] : memref<256x128xbf16, #tpu.memory_space<vmem>>, vector<256x128xbf16>
    %c0_1 = arith.constant 0 : index
    %c0_2 = arith.constant 0 : index
    %1 = vector.load %arg4[%c0_1, %c0_2] : memref<128x128xbf16, #tpu.memory_space<vmem>>, vector<128x128xbf16>
    %cst = arith.constant dense<0.000000e+00> : vector<256x128xf32>
    %2 = tpu.matmul %0, %1, %cst {dimension_numbers = #tpu.dot_dimension_numbers<[1], [0], [0], [1], [0, 0, 1, 1], [], []>} : vector<256x128xbf16>, vector<128x128xbf16>, vector<256x128xf32> -> vector<256x128xf32>
    %c0_3 = arith.constant 0 : index
    %c0_4 = arith.constant 0 : index
    %3 = vector.load %arg2[%c0_3, %c0_4] : memref<256x256xbf16, #tpu.memory_space<vmem>>, vector<256x256xbf16>
    %4 = arith.truncf %2 : vector<256x128xf32> to vector<256x128xbf16>
    %cst_5 = arith.constant dense<0.000000e+00> : vector<256x128xf32>
    %5 = tpu.matmul %3, %4, %cst_5 {dimension_numbers = #tpu.dot_dimension_numbers<[1], [0], [0], [1], [0, 0, 1, 1], [], []>} : vector<256x256xbf16>, vector<256x128xbf16>, vector<256x128xf32> -> vector<256x128xf32>
    %c0_i32 = arith.constant 0 : i32
    %6 = arith.cmpi eq, %arg1, %c0_i32 : i32
    %7 = arith.extui %6 : i1 to i32
    %c0_i32_6 = arith.constant 0 : i32
    %8 = arith.cmpi ne, %7, %c0_i32_6 : i32
    scf.if %8 {
      %cst_12 = arith.constant 0.000000e+00 : f32
      %15 = vector.broadcast %cst_12 : f32 to vector<256x128xf32>
      %c0_13 = arith.constant 0 : index
      %c0_14 = arith.constant 0 : index
      %16 = vector.load %arg7[%c0_13, %c0_14] : memref<256x128xf32, #tpu.memory_space<vmem>>, vector<256x128xf32>
      tpu.vector_store %arg7[%c0_13, %c0_14], %15 {strides = array<i32>} : memref<256x128xf32, #tpu.memory_space<vmem>>, vector<256x128xf32>,
    } else {
    }
    %c0_7 = arith.constant 0 : index
    %c0_8 = arith.constant 0 : index
    %9 = vector.load %arg7[%c0_7, %c0_8] : memref<256x128xf32, #tpu.memory_space<vmem>>, vector<256x128xf32>
    %10 = arith.addf %9, %5 : vector<256x128xf32>
    %c0_9 = arith.constant 0 : index
    %c0_10 = arith.constant 0 : index
    %11 = vector.load %arg7[%c0_9, %c0_10] : memref<256x128xf32, #tpu.memory_space<vmem>>, vector<256x128xf32>
    tpu.vector_store %arg7[%c0_9, %c0_10], %10 {strides = array<i32>} : memref<256x128xf32, #tpu.memory_space<vmem>>, vector<256x128xf32>,
    %c1_i32 = arith.constant 1 : i32
    %12 = arith.cmpi eq, %arg1, %c1_i32 : i32
    %13 = arith.extui %12 : i1 to i32
    %c0_i32_11 = arith.constant 0 : i32
    %14 = arith.cmpi ne, %13, %c0_i32_11 : i32
    scf.if %14 {
      %c0_12 = arith.constant 0 : index
      %c0_13 = arith.constant 0 : index
      %15 = vector.load %arg7[%c0_12, %c0_13] : memref<256x128xf32, #tpu.memory_space<vmem>>, vector<256x128xf32>
      %c0_14 = arith.constant 0 : index
      %c0_15 = arith.constant 0 : index
      %16 = vector.load %arg5[%c0_14, %c0_15] : memref<1x128xf32, #tpu.memory_space<vmem>>, vector<1x128xf32>
      %17 = vector.broadcast %16 : vector<1x128xf32> to vector<256x128xf32>
      %18 = arith.addf %15, %17 : vector<256x128xf32>
      %19 = arith.truncf %18 : vector<256x128xf32> to vector<256x128xbf16>
      %c0_16 = arith.constant 0 : index
      %c0_17 = arith.constant 0 : index
      %20 = vector.load %arg6[%c0_16, %c0_17] : memref<256x128xbf16, #tpu.memory_space<vmem>>, vector<256x128xbf16>
      tpu.vector_store %arg6[%c0_16, %c0_17], %19 {strides = array<i32>} : memref<256x128xbf16, #tpu.memory_space<vmem>>, vector<256x128xbf16>,
    } else {
    }
    return
  }
  func.func @transform_0(%arg0: i32, %arg1: i32) -> (i32, i32) {
    %c0_i32 = arith.constant 0 : i32
    return %arg0, %arg1 : i32, i32
  }
  func.func @transform_1(%arg0: i32, %arg1: i32) -> (i32, i32) {
    %c0_i32 = arith.constant 0 : i32
    %c0_i32_0 = arith.constant 0 : i32
    return %arg1, %c0_i32 : i32, i32
  }
  func.func @transform_2(%arg0: i32, %arg1: i32) -> (i32, i32) {
    %c0_i32 = arith.constant 0 : i32
    %c0_i32_0 = arith.constant 0 : i32
    %c0_i32_1 = arith.constant 0 : i32
    return %c0_i32, %c0_i32_0 : i32, i32
  }
  func.func @transform_3(%arg0: i32, %arg1: i32) -> (i32, i32) {
    %c0_i32 = arith.constant 0 : i32
    %c0_i32_0 = arith.constant 0 : i32
    %c0_i32_1 = arith.constant 0 : i32
    return %c0_i32, %c0_i32_0 : i32, i32
  }
  func.func @transform_4(%arg0: i32, %arg1: i32) -> (i32, i32) {
    %c0_i32 = arith.constant 0 : i32
    %c0_i32_0 = arith.constant 0 : i32
    return %arg0, %c0_i32 : i32, i32
  }
}

</mosaic_0001>

<bundles_post_ra>
// kernel: tpu_custom_call.1
= control target key start
LH: loop header
LB: loop body
LE: loop exit
PB: predicated region body
PF: predicated region fallthrough
CT: control target
= control target key end

     0   :  { %s2971_s0 = inlined_call_operand.hbm [shape: bf16[512,512], index: 0, kind: input, shape index: {}]   ;;  %s2972_s1 = inlined_call_operand.hbm [shape: bf16[512,128], index: 1, kind: input, shape index: {}]   ;;  %s2973_s2 = inlined_call_operand.hbm [shape: bf16[128,128], index: 2, kind: input, shape index: {}]   ;;  %s2974_s3 = inlined_call_operand.vmem [shape: f32[1,128], index: 3, kind: input, shape index: {}]   ;;  %s2975_s4 = inlined_call_operand.hbm [shape: bf16[512,128], index: 4, kind: output, shape index: {}]  }
   0x1   :  { %2997 = sst [smem:[#allocation25_spill]] %s2971_s0 }
   0x2   :  { %2998 = sst [smem:[#allocation26_spill]] %s2973_s2 }
   0x3   :  { %2999 = sst [smem:[#allocation27_spill]] %s2974_s3 }
   0x4   :  { %3000 = sst [smem:[#allocation28_spill]] %s2975_s4 }
   0x5   :  { %9 = vsyncpa [#allocation4], 0 }
   0x6   :  { %11 = vsyncpa [#allocation4 + $0x1], 0 }
   0x7   :  { %12 = vsyncpa [#allocation7], 0 }
   0x8   :  { %14 = vsyncpa [#allocation7 + $0x1], 0 }
   0x9   :  { %15 = vsyncpa [#allocation5], 0 }
   0xa   :  { %17 = vsyncpa [#allocation5 + $0x1], 0  ;;  %s2453_s15 = smov 0   ;;  %s2455_s16 = smov 0  }
   0xb   :  { %s2457_s17 = smov 0   ;;  %s2459_s18 = smov 0  }
   0xc   :  { %s2461_s19 = smov 0   ;;  %s2463_s20 = smov 0  }
   0xd   :  { %s2465_s21 = smov 0   ;;  %s2467_s22 = smov 0  }
   0xe   :  { %s2469_s23 = smov 0   ;;  %s2471_s24 = smov 0  }
   0xf   :  { %s2473_s25 = smov 0   ;;  %s2475_s26 = smov 0  }
  0x10   :  { %s2477_s27 = smov 0   ;;  %s2479_s28 = smov 0  }
  0x11 LB: > { %3001 = sst [smem:[#allocation14_spill]] %s2362_s15  ;;  %s2520_s29 = sadd.s32 4294967295, %s2414_s28   ;;  %s2414_s28 = sphi %s2479_s28, %s23_s28   ;;  %s2410_s27 = sphi %s2477_s27, %s3062_s27   ;;  %s2406_s26 = sphi %s2475_s26, %s3061_s26   ;;  %s2402_s25 = sphi %s2473_s25, %s3060_s25   ;;  %s2398_s24 = sphi %s2471_s24, %s3059_s24   ;;  %s2394_s23 = sphi %s2469_s23, %s3058_s23   ;;  %s2390_s22 = sphi %s2467_s22, %s3057_s22   ;;  %s2386_s21 = sphi %s2465_s21, %s3056_s21   ;;  %s2382_s20 = sphi %s2463_s20, %s3055_s20   ;;  %s2378_s19 = sphi %s2461_s19, %s3054_s19   ;;  %s2374_s18 = sphi %s2459_s18, %s3053_s18   ;;  %s2370_s17 = sphi %s2457_s17, %s3052_s17   ;;  %s2366_s16 = sphi %s2455_s16, %s3051_s16   ;;  %s2362_s15 = sphi %s2453_s15, %s3050_s15  }
  0x12   : > { %3002 = sst [smem:[#allocation15_spill]] %s2366_s16  ;;  %s1515_s30 = sadd.s32 4294967294, %s2414_s28  }
  0x13   : > { %3003 = sst [smem:[#allocation16_spill]] %s2398_s24  ;;  %p57_p0 = scmp.ne.s32.totalorder %s2390_s22, %s2386_s21 }
  0x14   : > { %3004 = sst [smem:[#allocation17_spill]] %s2402_s25  ;;  %p2994_p1 = scmp.eq.s32.totalorder %s2520_s29, 0 }
  0x15   : > { %3005 = sst [smem:[#allocation18_spill]] %s2520_s29  ;;  %p83_p2 = scmp.ne.s32.totalorder %s2378_s19, %s2374_s18 }
  0x16   : > { %p2529_p3 = por %p2994_p1, %p57_p0  ;;  %p148_p4 = scmp.ne.s32.totalorder %s2370_s17, %s2366_s16 }
  0x17   : > { %p2537_p5 = por %p83_p2, %p2994_p1  ;;  %p149_p6 = scmp.eq.s32.totalorder %s2520_s29, 3 }
  0x18   : > { %s3006_s6 = scalar_select %p2529_p3, 1, 0 }
  0x19   : > { %s3008_s7 = scalar_select %p2537_p5, 1, 0 }
  0x1a   : > { %3007 = sst [smem:[#allocation19_spill]] %s3006_s6  ;;  %p154_p7 = scmp.ne.s32.totalorder %s2366_s16, %s2362_s15 }
  0x1b   : > { %3009 = sst [smem:[#allocation20_spill]] %s3008_s7  ;;  %p155_p8 = scmp.eq.s32.totalorder %s1515_s30, 3 }
  0x1c   : > { %p2544_p9 = por %p149_p6, %p148_p4  ;;  %p1516_p10 = scmp.ge.s32.totalorder %s2414_s28, 1 }
  0x1d   : > { %p2549_p11 = por %p155_p8, %p154_p7  ;;  %p162_p12 = scmp.lt.s32.totalorder %s2414_s28, 5 }
  0x1e   : > { %s3010_s8 = scalar_select %p2544_p9, 1, 0 }
  0x1f   : > { %s3012_s9 = scalar_select %p2549_p11, 1, 0 }
  0x20   : > { %3011 = sst [smem:[#allocation21_spill]] %s3010_s8  ;;  %p2554_p13 = pnand %p1516_p10, %p162_p12 }
  0x21   : > { %3013 = sst [smem:[#allocation22_spill]] %s3012_s9  ;;  %s2416_s11 = smov [#allocation8]  }
  0x22   : > { %s174_s12 = sshll.u32 %s2416_s11, 4  ;;  %p1968_p0 = pneg %p2554_p13  ;;  %s175_s12 = int_to_ptr.vmem [resolvable:$true] %s174_s12 }
  0x23   : > { %s2191_s13 = scalar_lea.vmem %s175_s12, 1024  ;;  %p2199_p9 = scmp.lt.s32.totalorder %s175_s12, %s175_s12 }
  0x24   : > { %p1969_p2 = pnand %p1968_p0, %p2994_p1  ;;  %p2192_p6 = scmp.ne.s32.totalorder %s175_s12, %s2191_s13 }
  0x25   : > { %p2200_p11 = scmp.lt.s32.totalorder %s2191_s13, %s2191_s13 }
  0x26   : > { %p2182_p4 = pneg %p1969_p2 }
  0x27   : > { %p2201_p5 = por %p2200_p11, %p2199_p9 }
  0x28   : > { %p2194_p7 = pnand %p2192_p6, %p2182_p4 }
  0x2a   : > { %p2195_p8 = pneg %p2194_p7 }
  0x2c   : > { %p2202_p10 = pnand %p2201_p5, %p2195_p8 }
  0x2e   : > { %2205 = shalt.err (!%p2202_p10)
}
  0x2f   : > { %s2979_s14 = smov 64   ;;  %s2980_s18 = smov 4  }
  0x30   : > { %s3015_s2 = sld [smem:[#allocation26_spill]]  ;;  %s32_s11 = sadd.s32 1, %s2406_s26 }
  0x31   : > { %p33_p5 = scmp.ge.s32.totalorder %s32_s11, 2  ;;  %s35_s13 = sadd.s32 1, %s2410_s27 }
  0x32   : > { %s44_s5 = sadd.s32 1, %s2394_s23  ;;  %p51_p9 = scmp.ne.s32.totalorder %s2394_s23, %s2390_s22 }
  0x33   : > { %s3064_s11 = smov (%p33_p5, %s32_s11), 0  ;;  %s3066_s13 = smov (!%p33_p5, %s35_s13), %s2410_s27 }
  0x34   : > { %3016 = sst [smem:[#allocation23_spill]] %s3064_s11  ;;  %s2578_s9 = ssub.s32 %s2406_s26, %s3064_s11 }
  0x35   : > { %p2995_p11 = scmp.eq.s32.totalorder %s2414_s28, 0  ;;  %p37_p12 = scmp.ge.s32.totalorder %s3066_s13, 2 }
  0x36   : > { %1971 = dma.hbm_to_vmem [thread:$0]  (!%p1969_p2), %s3015_s2, 1024, %s175_s12, [#allocation7], %s2979_s14, %s2979_s14, %s2980_s18  }
  0x37   : > { %p68_p0 = scmp.eq.s32.totalorder %s2578_s9, 0  ;;  %p2584_p2 = por %p2995_p11, %p51_p9 }
  0x38   : > { %p1984_p4 = scmp.lt.s32.totalorder %s2414_s28, 4  ;;  %s3068_s13 = smov (%p37_p12, %s3066_s13), 0 }
  0x39   : > { %3018 = sst [smem:[#allocation24_spill]] %s3068_s13  ;;  %s191_s21 = sand.u32 1, %s2394_s23  }
  0x3a   : > { %s1521_s30 = sshll.u32 %s2406_s26, 1  ;;  %s39_s14 = ssub.s32 %s2410_s27, %s3068_s13 }
  0x3b   : > { %s41_s18 = sor.u32 %s2578_s9, %s39_s14  ;;  %p136_p6 = scmp.eq.s32.totalorder %s39_s14, 0 }
  0x3c   : > { %p42_p7 = scmp.eq.s32.totalorder %s41_s18, 0  ;;  %s1519_s2 = sshll.u32 %s191_s21, 8 }
  0x3d   : > { %s3019_s11 = sadd.s32 1, %s2370_s17  ;;  %s1628_s8 = sshll.u32 %s2410_s27, 7 }
  0x3e   : > { %s2599_s15 = scalar_select %p136_p6, %s2370_s17, %s3019_s11  }
  0x3f   : > { %s2602_s4 = scalar_select %p42_p7, %s2394_s23, %s44_s5  }
  0x40   : > { %s202_s25 = sadd.s32 %s1628_s8, %s1521_s30  ;;  %s195_s3 = scalar_lea.vmem [#allocation3], %s1519_s2 }
  0x41   : > { %s205_s24 = sshll.u32 %s195_s3, 4  ;;  %s1523_s16 = sshll.u32 %s202_s25, 6  ;;  %s206_s24 = int_to_ptr.vmem [resolvable:$true] %s205_s24 }
  0x42   : > { %s3020_s0 = sld [smem:[#allocation25_spill]]  ;;  %p2612_p8 = pnand %p1984_p4, %p2584_p2 }
  0x43   : > { %s192_s18 = scalar_lea.sflag [#allocation4], %s191_s21  ;;  %s2219_s5 = scalar_lea.vmem %s206_s24, 4096 }
  0x44   : > { %p2208_p10 = pneg %p2612_p8  ;;  %p2220_p5 = scmp.ne.s32.totalorder %s206_s24, %s2219_s5 }
  0x45   : > { %s2419_s2 = smov [#allocation3]  }
  0x46   : > { %p2222_p9 = pnand %p2220_p5, %p2208_p10  ;;  %s2224_s3 = sshll.u32 %s2419_s2, 4  ;;  %s2225_s3 = int_to_ptr.vmem [resolvable:$false] %s2224_s3 }
  0x47   : > { %s2226_s25 = scalar_lea.vmem %s2225_s3, 8192  ;;  %p2227_p6 = scmp.lt.s32.totalorder %s206_s24, %s2225_s3 }
  0x48   : > { %s204_s6 = scalar_lea.hbm %s3020_s0, %s1523_s16  ;;  %p2223_p12 = pneg %p2222_p9 }
  0x49   : > { %p2228_p7 = scmp.lt.s32.totalorder %s2226_s25, %s2219_s5 }
  0x4b   : > { %p2229_p1 = por %p2228_p7, %p2227_p6 }
  0x4d   : > { %p2230_p11 = pnand %p2229_p1, %p2223_p12 }
  0x4f   : > { %2233 = shalt.err (!%p2230_p11)
}
  0x50   : > { %s2420_s16 = smov 256   ;;  %s2421_s29 = smov 128  }
  0x51   : > { %s2422_s7 = smov 8   ;;  %s215_s8 = sand.u32 1, %s2414_s28  }
  0x52   : > { %1975 = dma.hbm_to_vmem [thread:$0]  (!%p2612_p8), %s204_s6, 4096, %s206_s24, %s192_s18, %s2420_s16, %s2421_s29, %s2422_s7  }
  0x53   : > { %s70_s11 = sadd.s32 1, %s2382_s20  ;;  %p77_p1 = scmp.ne.s32.totalorder %s2382_s20, %s2378_s19 }
  0x54   : > { %s2627_s12 = scalar_select %p68_p0, %s2382_s20, %s70_s11  }
  0x55   : > { %p3022_p11 = scmp.eq.s32.totalorder %s2414_s28, 0  ;;  %s217_s21 = sand.u32 1, %s2382_s20  }
  0x56   : > { %s1524_s30 = sshll.u32 %s217_s21, 7  ;;  %s1629_s5 = sshll.u32 %s2406_s26, 11 }
  0x57   : > { %p79_p2 = por %p77_p1, %p3022_p11  ;;  %s225_s25 = scalar_lea.hbm %s2972_s1, %s1629_s5 }
  0x58   : > { %s219_s0 = scalar_lea.vmem [#allocation6], %s1524_s30  ;;  %s216_s6 = scalar_lea.sflag [#allocation7], %s215_s8 }
  0x59   : > { %s226_s13 = sshll.u32 %s219_s0, 4  ;;  %p2638_p10 = pnand %p1984_p4, %p79_p2  ;;  %s227_s13 = int_to_ptr.vmem [resolvable:$true] %s226_s13 }
  0x5a   : > { %s2247_s9 = scalar_lea.vmem %s227_s13, 2048  ;;  %s2423_s14 = smov [#allocation6]  }
  0x5b   : > { %p2236_p0 = pneg %p2638_p10  ;;  %p2248_p8 = scmp.ne.s32.totalorder %s227_s13, %s2247_s9 }
  0x5c   : > { %s2252_s18 = sshll.u32 %s2423_s14, 4  ;;  %s2253_s18 = int_to_ptr.vmem [resolvable:$false] %s2252_s18 }
  0x5d   : > { %p2250_p5 = pnand %p2248_p8, %p2236_p0  ;;  %s2254_s16 = scalar_lea.vmem %s2253_s18, 4096 }
  0x5e   : > { %p2255_p12 = scmp.lt.s32.totalorder %s227_s13, %s2253_s18  ;;  %p2256_p6 = scmp.lt.s32.totalorder %s2254_s16, %s2247_s9 }
  0x5f   : > { %p2251_p9 = pneg %p2250_p5 }
  0x60   : > { %p2257_p7 = por %p2256_p6, %p2255_p12 }
  0x62   : > { %p2258_p4 = pnand %p2257_p7, %p2251_p9 }
  0x64   : > { %2261 = shalt.err (!%p2258_p4)
}
  0x65   : > { %s3024_s0 = smov 4   ;;  %s3025_s29 = smov 64  }
  0x66   : > { %1978 = dma.hbm_to_vmem [thread:$0]  (!%p2638_p10), %s225_s25, 2048, %s227_s13, %s216_s6, %s3025_s29, %s3025_s29, %s3024_s0  }
  0x67   : > { %238 = sbr.rel (%p2554_p13) target bundleno = 812 (0x32c), region = 36  ;;  %s240_s8 = sand.u32 (!%p2554_p13), 1, %s2390_s22  }
  0x68   : > { %s1528_s11 = sshll.u32 (!%p2554_p13), %s240_s8, 8  ;;  %s241_s21 = scalar_lea.sflag (!%p2554_p13), [#allocation4], %s240_s8 }
  0x69   : > { %s2652_s30 = scalar_lea.vmem (!%p2554_p13), [#allocation3], %s1528_s11 }
  0x6c   : > { %2345 = dma.done.wait (%p2529_p3), %s241_s21, 4096  }
  0x6d   : > { %2347 = vsyncadd (%p2529_p3), %s241_s21, 4294963200  ;;  %s3027_s5 = sld [smem:[#allocation18_spill]]  ;;  %s251_s13 = sand.u32 1, %s2378_s19  }
  0x6e   : > { %s3028_s2 = sld [smem:[#allocation20_spill]]  ;;  %s1529_s25 = sshll.u32 %s251_s13, 7 }
  0x6f   : > { %s2660_s24 = scalar_lea.vmem [#allocation6], %s1529_s25 }
  0x73   : > { %s249_s3 = sand.u32 1, %s3027_s5  }
  0x74   : > { %s250_s10 = scalar_lea.sflag [#allocation7], %s249_s3  ;;  %p3029_p13 = scmp.ne.s32.totalorder %s3028_s2, 0 }
  0x76   : > { %2349 = dma.done.wait (%p3029_p13), %s250_s10, 2048  }
  0x77   : > { %2351 = vsyncadd (%p3029_p13), %s250_s10, 4294965248  ;;  %p3030_p1 = scmp.eq.s32.totalorder %s3027_s5, 0 }
  0x79   : > { %2353 = dma.done.wait (%p3030_p1), [#allocation7], 1024   ;;  %p3031_p11 = pmov %p3030_p1 }
  0x7a   : > { %s3032_s6 = sld [smem:[#allocation15_spill]]  ;;  %v2108_v0 = vld [vmem:[#allocation8 + $0x38] sm:$0xff]   ;;  %v2109_v1 = vld [vmem:[#allocation8 + $0x30] sm:$0xff]   ;;  %v2110_v2 = vld [vmem:[#allocation8 + $0x28] sm:$0xff]  }
  0x7b   : > { %2355 = vsyncadd (%p3031_p11), [#allocation7], 4294966272  ;;  %1894 = vmatprep.subr.bf16.mxu0 %v2108_v0  ;;  %v2111_v3 = vld [vmem:[#allocation8 + $0x20] sm:$0xff]   ;;  %v2112_v5 = vld [vmem:[#allocation8 + $0x18] sm:$0xff]   ;;  %s3033_s16 = sld [smem:[#allocation16_spill]] }
  0x7c   : > { %1895 = vmatpush3.bf16.msra.mxu0 %v2108_v0  ;;  %v2116_v4 = vld [vmem:[%s2660_s24] sm:$0xff]   ;;  %v2113_v6 = vld [vmem:[#allocation8 + $0x10] sm:$0xff]   ;;  %v2114_v7 = vld [vmem:[#allocation8 + $0x8] sm:$0xff]  }
  0x7d   : > { %1896 = vmatprep.subr.bf16.mxu0 %v2109_v1  ;;  %1910 = vmatprep.mubr.bf16.mxu0 %v2116_v4  ;;  %v2115_v8 = vld [vmem:[#allocation8] sm:$0xff]   ;;  %v2117_v9 = vld [vmem:[%s2660_s24 + $0x8] sm:$0xff]   ;;  %v2118_v10 = vld [vmem:[%s2660_s24 + $0x10] sm:$0xff]  }
  0x7e   : > { %v2119_v11 = vld [vmem:[%s2660_s24 + $0x18] sm:$0xff]   ;;  %v2120_v12 = vld [vmem:[%s2660_s24 + $0x20] sm:$0xff]   ;;  %v2121_v13 = vld [vmem:[%s2660_s24 + $0x28] sm:$0xff]  }
  0x7f   : > { %v2122_v14 = vld [vmem:[%s2660_s24 + $0x30] sm:$0xff]   ;;  %v2123_v15 = vld [vmem:[%s2660_s24 + $0x38] sm:$0xff]   ;;  %v2124_v16 = vld [vmem:[%s2660_s24 + $0x40] sm:$0xff]  }
  0x80   : > { %s284_s9 = sand.u32 1, %s3032_s6   ;;  %1897 = vmatpush3.bf16.msra.mxu0 %v2109_v1  ;;  %v2125_v17 = vld [vmem:[%s2660_s24 + $0x48] sm:$0xff]   ;;  %v2126_v18 = vld [vmem:[%s2660_s24 + $0x50] sm:$0xff]   ;;  %v2127_v19 = vld [vmem:[%s2660_s24 + $0x58] sm:$0xff]  }
  0x81   : > { %s2673_s14 = sshll.u32 %s284_s9, 7  ;;  %1898 = vmatprep.subr.bf16.mxu0 %v2110_v2  ;;  %v2128_v20 = vld [vmem:[%s2660_s24 + $0x60] sm:$0xff]   ;;  %v2129_v21 = vld [vmem:[%s2660_s24 + $0x68] sm:$0xff]   ;;  %v2130_v22 = vld [vmem:[%s2660_s24 + $0x70] sm:$0xff]   ;;  %p1588_p3 = scmp.ne.s32.totalorder %s3033_s16, 0 }
  0x82   : > { %v2131_v23 = vld [vmem:[%s2660_s24 + $0x78] sm:$0xff]   ;;  %v2134_v24 = vld [vmem:[%s2652_s30 + $0x44] ss:$8 sps:$4 sm:$0xff]   ;;  %s2796_s18 = scalar_lea.vmem [#allocation9], %s2673_s14 }
  0x83   : > { %917 = vmatprep.mubr.bf16.mxu1 %v2134_v24  ;;  %v2158_v41 = vld [vmem:[%s2652_s30 + $0x4] ss:$8 sps:$4 sm:$0xff]  }
  0x84   : > { %1899 = vmatpush3.bf16.msra.mxu0 %v2110_v2  ;;  %v2144_v24 = vld [vmem:[%s2652_s30 + $0x84] ss:$8 sps:$4 sm:$0xff]  }
  0x85   : > { %1900 = vmatprep.subr.bf16.mxu0 %v2111_v3 }
  0x88   : > { %1901 = vmatpush3.bf16.msra.mxu0 %v2111_v3 }
  0x89   : > { %1902 = vmatprep.subr.bf16.mxu0 %v2112_v5 }
  0x8c   : > { %1903 = vmatpush3.bf16.msra.mxu0 %v2112_v5 }
  0x8d   : > { %1904 = vmatprep.subr.bf16.mxu0 %v2113_v6 }
  0x90   : > { %1905 = vmatpush3.bf16.msra.mxu0 %v2113_v6 }
  0x91   : > { %1906 = vmatprep.subr.bf16.mxu0 %v2114_v7 }
  0x94   : > { %1907 = vmatpush3.bf16.msra.mxu0 %v2114_v7 }
  0x95   : > { %1908 = vmatprep.subr.bf16.mxu0 %v2115_v8 }
  0x98   : > { %1909 = vmatpush3.bf16.msra.mxu0 %v2115_v8 }
  0x9b   : > { %1911 = vmatmul.mubr.bf16.vlgmr.msra.gmra.mxu0 %v2117_v9 }
  0x9c   : > { %1914 = vmatprep.mubr.bf16.mxu0 %v2118_v10  ;;  %v2132_v10 = vld [vmem:[%s2652_s30 + $0x40] ss:$8 sps:$4 sm:$0xff]  }
  0xa3   : > { %1915 = vmatmul.mubr.bf16.gmra.mxu0 %v2119_v11  ;;  %v2156_v11 = vld [vmem:[%s2652_s30] ss:$8 sps:$4 sm:$0xff]  }
  0xa4   : > { %1918 = vmatprep.mubr.bf16.mxu0 %v2120_v12  ;;  %v2135_v12 = vld [vmem:[%s2652_s30 + $0x54] ss:$8 sps:$4 sm:$0xff]  }
  0xab   : > { %1919 = vmatmul.mubr.bf16.gmra.mxu0 %v2121_v13  ;;  %v2162_v13 = vld [vmem:[%s2652_s30 + $0x14] ss:$8 sps:$4 sm:$0xff]  }
  0xac   : > { %1922 = vmatprep.mubr.bf16.mxu0 %v2122_v14  ;;  %v2137_v14 = vld [vmem:[%s2652_s30 + $0x50] ss:$8 sps:$4 sm:$0xff]  }
  0xb3   : > { %1923 = vmatmul.mubr.bf16.gmra.mxu0 %v2123_v15  ;;  %v2164_v15 = vld [vmem:[%s2652_s30 + $0x10] ss:$8 sps:$4 sm:$0xff]  }
  0xb4   : > { %1926 = vmatprep.mubr.bf16.mxu0 %v2124_v16  ;;  %v2138_v16 = vld [vmem:[%s2652_s30 + $0x64] ss:$8 sps:$4 sm:$0xff]  }
  0xbb   : > { %1927 = vmatmul.mubr.bf16.gmra.mxu0 %v2125_v17  ;;  %v2168_v17 = vld [vmem:[%s2652_s30 + $0x24] ss:$8 sps:$4 sm:$0xff]  }
  0xbc   : > { %1930 = vmatprep.mubr.bf16.mxu0 %v2126_v18  ;;  %v2140_v18 = vld [vmem:[%s2652_s30 + $0x60] ss:$8 sps:$4 sm:$0xff]  }
  0xc3   : > { %1931 = vmatmul.mubr.bf16.gmra.mxu0 %v2127_v19  ;;  %v2170_v19 = vld [vmem:[%s2652_s30 + $0x20] ss:$8 sps:$4 sm:$0xff]  }
  0xc4   : > { %1934 = vmatprep.mubr.bf16.mxu0 %v2128_v20  ;;  %v2141_v20 = vld [vmem:[%s2652_s30 + $0x74] ss:$8 sps:$4 sm:$0xff]  }
  0xcb   : > { %1935 = vmatmul.mubr.bf16.gmra.mxu0 %v2129_v21  ;;  %v2174_v21 = vld [vmem:[%s2652_s30 + $0x34] ss:$8 sps:$4 sm:$0xff]  }
  0xcc   : > { %1938 = vmatprep.mubr.bf16.mxu0 %v2130_v22  ;;  %v2143_v22 = vld [vmem:[%s2652_s30 + $0x70] ss:$8 sps:$4 sm:$0xff]  }
  0xd3   : > { %1939 = vmatmul.mubr.bf16.gmra.mxu0 %v2131_v23  ;;  %v2176_v23 = vld [vmem:[%s2652_s30 + $0x30] ss:$8 sps:$4 sm:$0xff]  }
  0xd4   : > { %885 = vmatprep.mubr.bf16.mxu0 %v2158_v41 }
 0x15b   : > { %v1912_v25 = vpop.f32.mrf.mxu0 }
 0x15d   : > { %v518_v26 = vpop.f32.mrf.mxu0 }
 0x15f   : > { %v1913_v27 = vpop.f32.mrf.mxu0 }
 0x160   : > { %v2692_v28 = vpack.c.bf16 %v1913_v27, %v1912_v25  ;;  %v2146_v25 = vld [vmem:[%s2652_s30 + $0x80] ss:$8 sps:$4 sm:$0xff]   ;;  %v2149_v27 = vld [vmem:[%s2652_s30 + $0x90] ss:$8 sps:$4 sm:$0xff]  }
 0x161   : > { %v521_v29 = vpop.f32.mrf.mxu0 }
 0x162   : > { %v2694_v30 = vpack.c.bf16 %v521_v29, %v518_v26  ;;  %v2147_v26 = vld [vmem:[%s2652_s30 + $0x94] ss:$8 sps:$4 sm:$0xff]   ;;  %v2152_v29 = vld [vmem:[%s2652_s30 + $0xa0] ss:$8 sps:$4 sm:$0xff]  }
 0x163   : > { %v1916_v31 = vpop.f32.mrf.mxu0 }
 0x165   : > { %v534_v32 = vpop.f32.mrf.mxu0 }
 0x167   : > { %v1917_v33 = vpop.f32.mrf.mxu0 }
 0x168   : > { %v680_v34 = vpack.c.bf16 %v1917_v33, %v1916_v31  ;;  %v2155_v31 = vld [vmem:[%s2652_s30 + $0xb0] ss:$8 sps:$4 sm:$0xff]   ;;  %v2161_v33 = vld [vmem:[%s2652_s30 + $0xc0] ss:$8 sps:$4 sm:$0xff]  }
 0x169   : > { %v537_v35 = vpop.f32.mrf.mxu0 }
 0x16a   : > { %v679_v36 = vpack.c.bf16 %v537_v35, %v534_v32  ;;  %v2159_v32 = vld [vmem:[%s2652_s30 + $0xc4] ss:$8 sps:$4 sm:$0xff]   ;;  %v2167_v35 = vld [vmem:[%s2652_s30 + $0xd0] ss:$8 sps:$4 sm:$0xff]  }
 0x16b   : > { %v1920_v37 = vpop.f32.mrf.mxu0 }
 0x16d   : > { %v550_v38 = vpop.f32.mrf.mxu0 }
 0x16f   : > { %v1921_v39 = vpop.f32.mrf.mxu0 }
 0x170   : > { %v682_v3 = vpack.c.bf16 %v1921_v39, %v1920_v37  ;;  %v2173_v37 = vld [vmem:[%s2652_s30 + $0xe0] ss:$8 sps:$4 sm:$0xff]   ;;  %v2179_v39 = vld [vmem:[%s2652_s30 + $0xf0] ss:$8 sps:$4 sm:$0xff]  }
 0x171   : > { %v553_v40 = vpop.f32.mrf.mxu0 }
 0x172   : > { %v681_v5 = vpack.c.bf16 %v553_v40, %v550_v38  ;;  %v2177_v38 = vld [vmem:[%s2652_s30 + $0xf4] ss:$8 sps:$4 sm:$0xff]  }
 0x173   : > { %v1924_v42 = vpop.f32.mrf.mxu0 }
 0x175   : > { %v566_v43 = vpop.f32.mrf.mxu0 }
 0x177   : > { %v1925_v44 = vpop.f32.mrf.mxu0 }
 0x178   : > { %v684_v62 = vpack.c.bf16 %v1925_v44, %v1924_v42 }
 0x179   : > { %v569_v45 = vpop.f32.mrf.mxu0 }
 0x17a   : > { %v683_v1 = vpack.c.bf16 %v569_v45, %v566_v43 }
 0x17b   : > { %v1928_v46 = vpop.f32.mrf.mxu0 }
 0x17d   : > { %v582_v47 = vpop.f32.mrf.mxu0 }
 0x17f   : > { %v1929_v48 = vpop.f32.mrf.mxu0 }
 0x180   : > { %v686_v8 = vpack.c.bf16 %v1929_v48, %v1928_v46 }
 0x181   : > { %v585_v49 = vpop.f32.mrf.mxu0 }
 0x182   : > { %v685_v9 = vpack.c.bf16 %v585_v49, %v582_v47 }
 0x183   : > { %v1932_v50 = vpop.f32.mrf.mxu0 }
 0x185   : > { %v598_v51 = vpop.f32.mrf.mxu0 }
 0x187   : > { %v1933_v52 = vpop.f32.mrf.mxu0 }
 0x188   : > { %v688_v6 = vpack.c.bf16 %v1933_v52, %v1932_v50 }
 0x189   : > { %v601_v53 = vpop.f32.mrf.mxu0 }
 0x18a   : > { %v687_v7 = vpack.c.bf16 %v601_v53, %v598_v51 }
 0x18b   : > { %v1936_v54 = vpop.f32.mrf.mxu0 }
 0x18d   : > { %v614_v55 = vpop.f32.mrf.mxu0 }
 0x18f   : > { %v1937_v56 = vpop.f32.mrf.mxu0 }
 0x190   : > { %v690_v2 = vpack.c.bf16 %v1937_v56, %v1936_v54 }
 0x191   : > { %v617_v57 = vpop.f32.mrf.mxu0 }
 0x192   : > { %v689_v4 = vpack.c.bf16 %v617_v57, %v614_v55 }
 0x193   : > { %v1940_v58 = vpop.f32.mrf.mxu0 }
 0x195   : > { %v630_v59 = vpop.f32.mrf.mxu0 }
 0x197   : > { %v1941_v60 = vpop.f32.mrf.mxu0 }
 0x198   : > { %v692_v61 = vpack.c.bf16 %v1941_v60, %v1940_v58 }
 0x199   : > { %v633_v63 = vpop.f32.mrf.mxu0 }
 0x19a   : > { %v691_v0 = vpack.c.bf16 %v633_v63, %v630_v59  ;;  %1782 = vmatprep.subr.bf16.mxu0 %v692_v61  ;;  %1942 = vmatprep.subr.bf16.mxu1 %v692_v61 }
 0x19b   : > { %1783 = vmatpush3.bf16.msra.mxu0 %v684_v62  ;;  %1950 = vmatpush3.bf16.msra.mxu1 %v684_v62 }
 0x19c   : > { %1784 = vmatprep.subr.bf16.mxu0 %v691_v0  ;;  %1943 = vmatprep.subr.bf16.mxu1 %v691_v0 }
 0x19f   : > { %1785 = vmatpush3.bf16.msra.mxu0 %v683_v1  ;;  %1951 = vmatpush3.bf16.msra.mxu1 %v683_v1 }
 0x1a0   : > { %1786 = vmatprep.subr.bf16.mxu0 %v690_v2  ;;  %1944 = vmatprep.subr.bf16.mxu1 %v690_v2 }
 0x1a3   : > { %1787 = vmatpush3.bf16.msra.mxu0 %v682_v3  ;;  %1952 = vmatpush3.bf16.msra.mxu1 %v682_v3 }
 0x1a4   : > { %1788 = vmatprep.subr.bf16.mxu0 %v689_v4  ;;  %1945 = vmatprep.subr.bf16.mxu1 %v689_v4 }
 0x1a7   : > { %1789 = vmatpush3.bf16.msra.mxu0 %v681_v5  ;;  %1953 = vmatpush3.bf16.msra.mxu1 %v681_v5 }
 0x1a8   : > { %1790 = vmatprep.subr.bf16.mxu0 %v688_v6  ;;  %1946 = vmatprep.subr.bf16.mxu1 %v688_v6 }
 0x1ab   : > { %1791 = vmatpush3.bf16.msra.mxu0 %v680_v34  ;;  %1954 = vmatpush3.bf16.msra.mxu1 %v680_v34  ;;  %v2165_v34 = vld [vmem:[%s2652_s30 + $0xd4] ss:$8 sps:$4 sm:$0xff]  }
 0x1ac   : > { %1792 = vmatprep.subr.bf16.mxu0 %v687_v7  ;;  %1947 = vmatprep.subr.bf16.mxu1 %v687_v7 }
 0x1af   : > { %1793 = vmatpush3.bf16.msra.mxu0 %v679_v36  ;;  %1955 = vmatpush3.bf16.msra.mxu1 %v679_v36  ;;  %v2171_v36 = vld [vmem:[%s2652_s30 + $0xe4] ss:$8 sps:$4 sm:$0xff]  }
 0x1b0   : > { %1794 = vmatprep.subr.bf16.mxu0 %v686_v8  ;;  %1948 = vmatprep.subr.bf16.mxu1 %v686_v8 }
 0x1b3   : > { %1795 = vmatpush3.bf16.msra.mxu0 %v2692_v28  ;;  %1956 = vmatpush3.bf16.msra.mxu1 %v2692_v28  ;;  %v2150_v28 = vld [vmem:[%s2652_s30 + $0xa4] ss:$8 sps:$4 sm:$0xff]  }
 0x1b4   : > { %1796 = vmatprep.subr.bf16.mxu0 %v685_v9  ;;  %1949 = vmatprep.subr.bf16.mxu1 %v685_v9 }
 0x1b7   : > { %1797 = vmatpush3.bf16.msra.mxu0 %v2694_v30  ;;  %1957 = vmatpush3.bf16.msra.mxu1 %v2694_v30  ;;  %v2153_v30 = vld [vmem:[%s2652_s30 + $0xb4] ss:$8 sps:$4 sm:$0xff]  }
 0x1ba   : > { %918 = vmatmul.mubr.bf16.vlgmr.msra.gmra.mxu1 %v2132_v10  ;;  %886 = vmatmul.mubr.bf16.vlgmr.msra.gmra.mxu0 %v2156_v11 }
 0x1bb   : > { %925 = vmatprep.mubr.bf16.mxu1 %v2135_v12  ;;  %893 = vmatprep.mubr.bf16.mxu0 %v2162_v13 }
 0x1c2   : > { %926 = vmatmul.mubr.bf16.gmra.mxu1 %v2137_v14  ;;  %894 = vmatmul.mubr.bf16.gmra.mxu0 %v2164_v15 }
 0x1c3   : > { %933 = vmatprep.mubr.bf16.mxu1 %v2138_v16  ;;  %901 = vmatprep.mubr.bf16.mxu0 %v2168_v17 }
 0x1ca   : > { %934 = vmatmul.mubr.bf16.gmra.mxu1 %v2140_v18  ;;  %902 = vmatmul.mubr.bf16.gmra.mxu0 %v2170_v19 }
 0x1cb   : > { %941 = vmatprep.mubr.bf16.mxu1 %v2141_v20  ;;  %909 = vmatprep.mubr.bf16.mxu0 %v2174_v21 }
 0x1d2   : > { %942 = vmatmul.mubr.bf16.gmra.mxu1 %v2143_v22  ;;  %910 = vmatmul.mubr.bf16.gmra.mxu0 %v2176_v23 }
 0x1d3   : > { %949 = vmatprep.mubr.bf16.mxu1 %v2144_v24 }
 0x1da   : > { %950 = vmatmul.mubr.bf16.gmra.mxu1 %v2146_v25 }
 0x1db   : > { %957 = vmatprep.mubr.bf16.mxu1 %v2147_v26 }
 0x1e2   : > { %958 = vmatmul.mubr.bf16.gmra.mxu1 %v2149_v27 }
 0x1e3   : > { %965 = vmatprep.mubr.bf16.mxu1 %v2150_v28 }
 0x1ea   : > { %966 = vmatmul.mubr.bf16.gmra.mxu1 %v2152_v29 }
 0x1eb   : > { %973 = vmatprep.mubr.bf16.mxu1 %v2153_v30 }
 0x1f2   : > { %974 = vmatmul.mubr.bf16.gmra.mxu1 %v2155_v31 }
 0x1f3   : > { %981 = vmatprep.mubr.bf16.mxu1 %v2159_v32 }
 0x1fa   : > { %982 = vmatmul.mubr.bf16.gmra.mxu1 %v2161_v33 }
 0x1fb   : > { %989 = vmatprep.mubr.bf16.mxu1 %v2165_v34 }
 0x202   : > { %990 = vmatmul.mubr.bf16.gmra.mxu1 %v2167_v35 }
 0x203   : > { %997 = vmatprep.mubr.bf16.mxu1 %v2171_v36 }
 0x20a   : > { %998 = vmatmul.mubr.bf16.gmra.mxu1 %v2173_v37 }
 0x20b   : > { %1005 = vmatprep.mubr.bf16.mxu1 %v2177_v38 }
 0x212   : > { %1006 = vmatmul.mubr.bf16.gmra.mxu1 %v2179_v39 }
 0x27a   : > { %v1822_v40 = vpop.f32.mrf.mxu1  ;;  %v1798_v41 = vpop.f32.mrf.mxu0 }
 0x27c   : > { %v1823_v42 = vpop.f32.mrf.mxu1  ;;  %v1799_v43 = vpop.f32.mrf.mxu0 }
 0x27d   : > { %v2731_v44 = vadd.f32 %v1823_v42, %v1822_v40  ;;  %v2733_v45 = vadd.f32 %v1799_v43, %v1798_v41 }
 0x27e   : > { %v1825_v46 = vpop.f32.mrf.mxu1  ;;  %v1801_v47 = vpop.f32.mrf.mxu0 }
 0x280   : > { %v1826_v48 = vpop.f32.mrf.mxu1  ;;  %v1802_v49 = vpop.f32.mrf.mxu0 }
 0x281   : > { %v2735_v50 = vadd.f32 %v1826_v48, %v1825_v46  ;;  %v2737_v51 = vadd.f32 %v1802_v49, %v1801_v47 }
 0x282   : > { %v1828_v52 = vpop.f32.mrf.mxu1  ;;  %v1804_v53 = vpop.f32.mrf.mxu0 }
 0x284   : > { %v1829_v54 = vpop.f32.mrf.mxu1  ;;  %v1805_v55 = vpop.f32.mrf.mxu0 }
 0x285   : > { %v2739_v56 = vadd.f32 %v1829_v54, %v1828_v52  ;;  %v2741_v57 = vadd.f32 %v1805_v55, %v1804_v53 }
 0x286   : > { %v1831_v58 = vpop.f32.mrf.mxu1  ;;  %v1807_v59 = vpop.f32.mrf.mxu0 }
 0x288   : > { %v1832_v60 = vpop.f32.mrf.mxu1  ;;  %v1808_v61 = vpop.f32.mrf.mxu0 }
 0x289   : > { %v2743_v62 = vadd.f32 %v1832_v60, %v1831_v58  ;;  %v2745_v63 = vadd.f32 %v1808_v61, %v1807_v59 }
 0x28a   : > { %v1834_v0 = vpop.f32.mrf.mxu1  ;;  %v1810_v1 = vpop.f32.mrf.mxu0 }
 0x28c   : > { %v1835_v2 = vpop.f32.mrf.mxu1  ;;  %v1811_v3 = vpop.f32.mrf.mxu0 }
 0x28d   : > { %v2747_v4 = vadd.f32 %v1835_v2, %v1834_v0  ;;  %v2749_v5 = vadd.f32 %v1811_v3, %v1810_v1 }
 0x28e   : > { %v1837_v6 = vpop.f32.mrf.mxu1  ;;  %v1813_v7 = vpop.f32.mrf.mxu0 }
 0x290   : > { %v1838_v8 = vpop.f32.mrf.mxu1  ;;  %v1814_v9 = vpop.f32.mrf.mxu0 }
 0x291   : > { %v2751_v10 = vadd.f32 %v1838_v8, %v1837_v6  ;;  %v2753_v11 = vadd.f32 %v1814_v9, %v1813_v7 }
 0x292   : > { %v1840_v12 = vpop.f32.mrf.mxu1  ;;  %v1816_v13 = vpop.f32.mrf.mxu0 }
 0x294   : > { %v1841_v14 = vpop.f32.mrf.mxu1  ;;  %v1817_v15 = vpop.f32.mrf.mxu0 }
 0x295   : > { %v2755_v16 = vadd.f32 %v1841_v14, %v1840_v12  ;;  %v2757_v17 = vadd.f32 %v1817_v15, %v1816_v13 }
 0x296   : > { %v1843_v18 = vpop.f32.mrf.mxu1  ;;  %v1819_v19 = vpop.f32.mrf.mxu0 }
 0x298   : > { %v1844_v20 = vpop.f32.mrf.mxu1  ;;  %v1820_v21 = vpop.f32.mrf.mxu0 }
 0x299   : > { %v2759_v22 = vadd.f32 %v1844_v20, %v1843_v18  ;;  %v2761_v23 = vadd.f32 %v1820_v21, %v1819_v19 }
 0x29a   : > { %v1846_v24 = vpop.f32.mrf.mxu1 }
 0x29c   : > { %v1847_v25 = vpop.f32.mrf.mxu1 }
 0x29d   : > { %v2763_v26 = vadd.f32 %v1847_v25, %v1846_v24 }
 0x29e   : > { %v1849_v27 = vpop.f32.mrf.mxu1 }
 0x2a0   : > { %v1850_v28 = vpop.f32.mrf.mxu1 }
 0x2a1   : > { %v2765_v29 = vadd.f32 %v1850_v28, %v1849_v27 }
 0x2a2   : > { %v1852_v30 = vpop.f32.mrf.mxu1 }
 0x2a4   : > { %v1853_v31 = vpop.f32.mrf.mxu1 }
 0x2a5   : > { %v2767_v32 = vadd.f32 %v1853_v31, %v1852_v30 }
 0x2a6   : > { %v1855_v33 = vpop.f32.mrf.mxu1 }
 0x2a8   : > { %v1856_v34 = vpop.f32.mrf.mxu1 }
 0x2a9   : > { %v2769_v35 = vadd.f32 %v1856_v34, %v1855_v33 }
 0x2aa   : > { %v1858_v36 = vpop.f32.mrf.mxu1 }
 0x2ac   : > { %v1859_v37 = vpop.f32.mrf.mxu1 }
 0x2ad   : > { %v2771_v38 = vadd.f32 %v1859_v37, %v1858_v36 }
 0x2ae   : > { %v1861_v39 = vpop.f32.mrf.mxu1 }
 0x2b0   : > { %v1862_v40 = vpop.f32.mrf.mxu1 }
 0x2b1   : > { %v2773_v41 = vadd.f32 %v1862_v40, %v1861_v39 }
 0x2b2   : > { %v1864_v42 = vpop.f32.mrf.mxu1 }
 0x2b4   : > { %v1865_v43 = vpop.f32.mrf.mxu1 }
 0x2b5   : > { %v2775_v46 = vadd.f32 %v1865_v43, %v1864_v42 }
 0x2b6   : > { %v1867_v47 = vpop.f32.mrf.mxu1 }
 0x2b8   : > { %v1868_v48 = vpop.f32.mrf.mxu1 }
 0x2b9   : > { %v2777_v49 = vadd.f32 %v1868_v48, %v1867_v47 }
 0x2ba   : > { %v1870_v52 = vpop.f32.mrf.mxu1 }
 0x2bc   : > { %v1871_v53 = vpop.f32.mrf.mxu1 }
 0x2bd   : > { %v2779_v54 = vadd.f32 %v1871_v53, %v1870_v52 }
 0x2be   : > { %v1873_v55 = vpop.f32.mrf.mxu1 }
 0x2c0   : > { %v1874_v58 = vpop.f32.mrf.mxu1 }
 0x2c1   : > { %v2781_v59 = vadd.f32 %v1874_v58, %v1873_v55 }
 0x2c2   : > { %v1876_v60 = vpop.f32.mrf.mxu1 }
 0x2c4   : > { %v1877_v61 = vpop.f32.mrf.mxu1 }
 0x2c5   : > { %v2783_v0 = vadd.f32 %v1877_v61, %v1876_v60 }
 0x2c6   : > { %v1879_v1 = vpop.f32.mrf.mxu1 }
 0x2c8   : > { %v1880_v2 = vpop.f32.mrf.mxu1 }
 0x2c9   : > { %v2785_v3 = vadd.f32 %v1880_v2, %v1879_v1 }
 0x2ca   : > { %v1882_v6 = vpop.f32.mrf.mxu1 }
 0x2cc   : > { %v1883_v7 = vpop.f32.mrf.mxu1 }
 0x2cd   : > { %v2787_v8 = vadd.f32 %v1883_v7, %v1882_v6 }
 0x2ce   : > { %v1885_v9 = vpop.f32.mrf.mxu1 }
 0x2d0   : > { %v1886_v12 = vpop.f32.mrf.mxu1 }
 0x2d1   : > { %v2789_v13 = vadd.f32 %v1886_v12, %v1885_v9 }
 0x2d2   : > { %v1888_v14 = vpop.f32.mrf.mxu1 }
 0x2d4   : > { %v1889_v15 = vpop.f32.mrf.mxu1 }
 0x2d5   : > { %v2791_v18 = vadd.f32 %v1889_v15, %v1888_v14  ;;  %1017 = sbr.rel (%p1588_p3) target bundleno = 747 (0x2eb), region = 52 }
 0x2d6   : > { %v1891_v19 = vpop.f32.mrf.mxu1 }
 0x2d8   : > { %v1892_v20 = vpop.f32.mrf.mxu1 }
 0x2d9   : > { %v2793_v21 = vadd.f32 %v1892_v20, %v1891_v19 }
 0x2da   : > { %v2424_v24 = vmov 0.0  }
 0x2db   : > { %1018 = vst [vmem:[#allocation2 + $0xb0] sm:$0xff] %v2424_v24  ;;  %1019 = vst [vmem:[#allocation2] sm:$0xff] %v2424_v24 }
 0x2dc   : > { %1020 = vst [vmem:[#allocation2 + $0xd8] sm:$0xff] %v2424_v24  ;;  %1021 = vst [vmem:[#allocation2 + $0x18] sm:$0xff] %v2424_v24 }
 0x2dd   : > { %1022 = vst [vmem:[#allocation2 + $0x50] sm:$0xff] %v2424_v24  ;;  %1023 = vst [vmem:[#allocation2 + $0x68] sm:$0xff] %v2424_v24 }
 0x2de   : > { %1024 = vst [vmem:[#allocation2 + $0x30] sm:$0xff] %v2424_v24  ;;  %1025 = vst [vmem:[#allocation2 + $0x48] sm:$0xff] %v2424_v24 }
 0x2df   : > { %1026 = vst [vmem:[#allocation2 + $0x80] sm:$0xff] %v2424_v24  ;;  %1027 = vst [vmem:[#allocation2 + $0x88] sm:$0xff] %v2424_v24 }
 0x2e0   : > { %1028 = vst [vmem:[#allocation2 + $0xe8] sm:$0xff] %v2424_v24  ;;  %1029 = vst [vmem:[#allocation2 + $0xb8] sm:$0xff] %v2424_v24 }
 0x2e1   : > { %1030 = vst [vmem:[#allocation2 + $0x60] sm:$0xff] %v2424_v24  ;;  %1031 = vst [vmem:[#allocation2 + $0xf0] sm:$0xff] %v2424_v24 }
 0x2e2   : > { %1032 = vst [vmem:[#allocation2 + $0x8] sm:$0xff] %v2424_v24  ;;  %1033 = vst [vmem:[#allocation2 + $0x78] sm:$0xff] %v2424_v24 }
 0x2e3   : > { %1034 = vst [vmem:[#allocation2 + $0x38] sm:$0xff] %v2424_v24  ;;  %1035 = vst [vmem:[#allocation2 + $0x58] sm:$0xff] %v2424_v24 }
 0x2e4   : > { %1036 = vst [vmem:[#allocation2 + $0x40] sm:$0xff] %v2424_v24  ;;  %1037 = vst [vmem:[#allocation2 + $0xc8] sm:$0xff] %v2424_v24 }
 0x2e5   : > { %1038 = vst [vmem:[#allocation2 + $0xe0] sm:$0xff] %v2424_v24  ;;  %1039 = vst [vmem:[#allocation2 + $0x90] sm:$0xff] %v2424_v24 }
 0x2e6   : > { %1040 = vst [vmem:[#allocation2 + $0x70] sm:$0xff] %v2424_v24  ;;  %1041 = vst [vmem:[#allocation2 + $0xc0] sm:$0xff] %v2424_v24 }
 0x2e7   : > { %1042 = vst [vmem:[#allocation2 + $0xa8] sm:$0xff] %v2424_v24  ;;  %1043 = vst [vmem:[#allocation2 + $0xd0] sm:$0xff] %v2424_v24 }
 0x2e8   : > { %1044 = vst [vmem:[#allocation2 + $0x10] sm:$0xff] %v2424_v24  ;;  %1045 = vst [vmem:[#allocation2 + $0x28] sm:$0xff] %v2424_v24 }
 0x2e9   : > { %1046 = vst [vmem:[#allocation2 + $0xa0] sm:$0xff] %v2424_v24  ;;  %1047 = vst [vmem:[#allocation2 + $0xf8] sm:$0xff] %v2424_v24 }
 0x2ea   : > { %1048 = vst [vmem:[#allocation2 + $0x20] sm:$0xff] %v2424_v24  ;;  %1049 = vst [vmem:[#allocation2 + $0x98] sm:$0xff] %v2424_v24 }
 0x2eb PF: > { %v1050_v25 = vld [vmem:[#allocation2 + $0xb0] sm:$0xff]  ;;  %v1051_v27 = vld [vmem:[#allocation2] sm:$0xff]  ;;  %v1052_v28 = vld [vmem:[#allocation2 + $0xd8] sm:$0xff]  ;;  %s3034_s0 = sld [smem:[#allocation16_spill]] }
 0x2ec   : > { %v1082_v30 = vadd.f32 %v2733_v45, %v1050_v25  ;;  %v1083_v31 = vadd.f32 %v2737_v51, %v1051_v27  ;;  %v1084_v33 = vadd.f32 %v2741_v57, %v1052_v28  ;;  %v1053_v34 = vld [vmem:[#allocation2 + $0x18] sm:$0xff]  ;;  %v1054_v36 = vld [vmem:[#allocation2 + $0x50] sm:$0xff]  ;;  %v1055_v37 = vld [vmem:[#allocation2 + $0x68] sm:$0xff] }
 0x2ed   : > { %v1085_v39 = vadd.f32 %v2745_v63, %v1053_v34  ;;  %v1086_v40 = vadd.f32 %v2749_v5, %v1054_v36  ;;  %v1087_v42 = vadd.f32 %v2753_v11, %v1055_v37  ;;  %v1056_v43 = vld [vmem:[#allocation2 + $0x30] sm:$0xff]  ;;  %v1057_v47 = vld [vmem:[#allocation2 + $0x48] sm:$0xff]  ;;  %v1058_v48 = vld [vmem:[#allocation2 + $0x80] sm:$0xff] }
 0x2ee   : > { %1114 = vst [vmem:[#allocation2 + $0xb0] sm:$0xff] %v1082_v30  ;;  %1115 = vst [vmem:[#allocation2] sm:$0xff] %v1083_v31  ;;  %v1088_v45 = vadd.f32 %v2757_v17, %v1056_v43  ;;  %v1089_v51 = vadd.f32 %v2761_v23, %v1057_v47  ;;  %v1090_v57 = vadd.f32 %v2731_v44, %v1058_v48  ;;  %v1059_v52 = vld [vmem:[#allocation2 + $0x88] sm:$0xff]  ;;  %v1061_v55 = vld [vmem:[#allocation2 + $0xb8] sm:$0xff] }
 0x2ef   : > { %1116 = vst [vmem:[#allocation2 + $0xd8] sm:$0xff] %v1084_v33  ;;  %v1060_v53 = vld [vmem:[#allocation2 + $0xe8] sm:$0xff]  ;;  %1117 = vst [vmem:[#allocation2 + $0x18] sm:$0xff] %v1085_v39  ;;  %v1091_v63 = vadd.f32 %v2735_v50, %v1059_v52  ;;  %v1093_v11 = vadd.f32 %v2743_v62, %v1061_v55  ;;  %v1062_v58 = vld [vmem:[#allocation2 + $0x60] sm:$0xff] }
 0x2f0   : > { %1118 = vst [vmem:[#allocation2 + $0x50] sm:$0xff] %v1086_v40  ;;  %1119 = vst [vmem:[#allocation2 + $0x68] sm:$0xff] %v1087_v42  ;;  %v1092_v5 = vadd.f32 %v2739_v56, %v1060_v53  ;;  %v1063_v60 = vld [vmem:[#allocation2 + $0xf0] sm:$0xff]  ;;  %v1064_v61 = vld [vmem:[#allocation2 + $0x8] sm:$0xff]  ;;  %v1094_v44 = vadd.f32 %v2747_v4, %v1062_v58 }
 0x2f1   : > { %1120 = vst [vmem:[#allocation2 + $0x30] sm:$0xff] %v1088_v45  ;;  %1121 = vst [vmem:[#allocation2 + $0x48] sm:$0xff] %v1089_v51  ;;  %v1095_v17 = vadd.f32 %v2751_v10, %v1063_v60  ;;  %v1096_v23 = vadd.f32 %v2755_v16, %v1064_v61  ;;  %v1065_v1 = vld [vmem:[#allocation2 + $0x78] sm:$0xff]  ;;  %v1068_v7 = vld [vmem:[#allocation2 + $0x40] sm:$0xff]  ;;  %p1589_p2 = scmp.ne.s32.totalorder %s3034_s0, 1 }
 0x2f2   : > { %1122 = vst [vmem:[#allocation2 + $0x80] sm:$0xff] %v1090_v57  ;;  %v1066_v2 = vld [vmem:[#allocation2 + $0x38] sm:$0xff]  ;;  %1123 = vst [vmem:[#allocation2 + $0x88] sm:$0xff] %v1091_v63  ;;  %v1097_v50 = vadd.f32 %v2759_v22, %v1065_v1  ;;  %v1069_v9 = vld [vmem:[#allocation2 + $0xc8] sm:$0xff]  ;;  %v1100_v4 = vadd.f32 %v2767_v32, %v1068_v7  ;;  %s3035_s8 = sld [smem:[#allocation27_spill]] (!%p1589_p2) }
 0x2f3   : > { %v1067_v6 = vld [vmem:[#allocation2 + $0x58] sm:$0xff]  ;;  %1124 = vst [vmem:[#allocation2 + $0xe8] sm:$0xff] %v1092_v5  ;;  %1125 = vst [vmem:[#allocation2 + $0xb8] sm:$0xff] %v1093_v11  ;;  %v1098_v56 = vadd.f32 %v2763_v26, %v1066_v2  ;;  %v1070_v12 = vld [vmem:[#allocation2 + $0xe0] sm:$0xff]  ;;  %v1101_v10 = vadd.f32 %v2769_v35, %v1069_v9 }
 0x2f4   : > { %v1099_v62 = vadd.f32 %v2765_v29, %v1067_v6  ;;  %1126 = vst [vmem:[#allocation2 + $0x60] sm:$0xff] %v1094_v44  ;;  %1127 = vst [vmem:[#allocation2 + $0xf0] sm:$0xff] %v1095_v17  ;;  %v1102_v16 = vadd.f32 %v2771_v38, %v1070_v12  ;;  %v1071_v14 = vld [vmem:[#allocation2 + $0x90] sm:$0xff]  ;;  %v1073_v19 = vld [vmem:[#allocation2 + $0xc0] sm:$0xff] }
 0x2f5   : > { %1128 = vst [vmem:[#allocation2 + $0x8] sm:$0xff] %v1096_v23  ;;  %v1072_v15 = vld [vmem:[#allocation2 + $0x70] sm:$0xff]  ;;  %1129 = vst [vmem:[#allocation2 + $0x78] sm:$0xff] %v1097_v50  ;;  %v1103_v22 = vadd.f32 %v2773_v41, %v1071_v14  ;;  %v1105_v29 = vadd.f32 %v2777_v49, %v1073_v19  ;;  %v1074_v20 = vld [vmem:[#allocation2 + $0xa8] sm:$0xff] }
 0x2f6   : > { %1130 = vst [vmem:[#allocation2 + $0x38] sm:$0xff] %v1098_v56  ;;  %1131 = vst [vmem:[#allocation2 + $0x58] sm:$0xff] %v1099_v62  ;;  %v1104_v26 = vadd.f32 %v2775_v46, %v1072_v15  ;;  %v1075_v24 = vld [vmem:[#allocation2 + $0xd0] sm:$0xff]  ;;  %v1106_v32 = vadd.f32 %v2779_v54, %v1074_v20  ;;  %v1077_v27 = vld [vmem:[#allocation2 + $0x28] sm:$0xff] }
 0x2f7   : > { %v1076_v25 = vld [vmem:[#allocation2 + $0x10] sm:$0xff]  ;;  %1132 = vst [vmem:[#allocation2 + $0x40] sm:$0xff] %v1100_v4  ;;  %1133 = vst [vmem:[#allocation2 + $0xc8] sm:$0xff] %v1101_v10  ;;  %v1107_v35 = vadd.f32 %v2781_v59, %v1075_v24  ;;  %v1078_v28 = vld [vmem:[#allocation2 + $0xa0] sm:$0xff]  ;;  %v1109_v41 = vadd.f32 %v2785_v3, %v1077_v27 }
 0x2f8   : > { %1134 = vst [vmem:[#allocation2 + $0xe0] sm:$0xff] %v1102_v16  ;;  %v1108_v38 = vadd.f32 %v2783_v0, %v1076_v25  ;;  %v1079_v30 = vld [vmem:[#allocation2 + $0xf8] sm:$0xff]  ;;  %1135 = vst [vmem:[#allocation2 + $0x90] sm:$0xff] %v1103_v22  ;;  %v1110_v46 = vadd.f32 %v2787_v8, %v1078_v28  ;;  %v1080_v31 = vld [vmem:[#allocation2 + $0x20] sm:$0xff] }
 0x2f9   : > { %1136 = vst [vmem:[#allocation2 + $0x70] sm:$0xff] %v1104_v26  ;;  %1137 = vst [vmem:[#allocation2 + $0xc0] sm:$0xff] %v1105_v29  ;;  %v1111_v49 = vadd.f32 %v2789_v13, %v1079_v30  ;;  %v1081_v33 = vld [vmem:[#allocation2 + $0x98] sm:$0xff]  ;;  %v1112_v54 = vadd.f32 %v2791_v18, %v1080_v31  ;;  %1149 = sbr.rel (%p1589_p2) target bundleno = 784 (0x310), region = 56 }
 0x2fa   : > { %1138 = vst [vmem:[#allocation2 + $0xa8] sm:$0xff] %v1106_v32  ;;  %1139 = vst [vmem:[#allocation2 + $0xd0] sm:$0xff] %v1107_v35  ;;  %v1113_v59 = vadd.f32 %v2793_v21, %v1081_v33 }
 0x2fb   : > { %1140 = vst [vmem:[#allocation2 + $0x10] sm:$0xff] %v1108_v38  ;;  %1141 = vst [vmem:[#allocation2 + $0x28] sm:$0xff] %v1109_v41 }
 0x2fc   : > { %1142 = vst [vmem:[#allocation2 + $0xa0] sm:$0xff] %v1110_v46  ;;  %1143 = vst [vmem:[#allocation2 + $0xf8] sm:$0xff] %v1111_v49 }
 0x2fd   : > { %1144 = vst [vmem:[#allocation2 + $0x20] sm:$0xff] %v1112_v54  ;;  %1145 = vst [vmem:[#allocation2 + $0x98] sm:$0xff] %v1113_v59 }
 0x2fe   : > { %v1150_v0 = vld [vmem:[#allocation2 + $0xb0] sm:$0xff]  ;;  %v1151_v3 = vld [vmem:[#allocation2] sm:$0xff]  ;;  %v1152_v21 = vld [vmem:[#allocation2 + $0xd8] sm:$0xff] }
 0x2ff   : > { %v2835_v8 = vld [vmem:[%s3035_s8] ss:$0 sm:$0xff]  ;;  %v1153_v34 = vld [vmem:[#allocation2 + $0x18] sm:$0xff]  ;;  %v1154_v36 = vld [vmem:[#allocation2 + $0x50] sm:$0xff] }
 0x300   : > { %v1189_v13 = vadd.f32 %v2835_v8, %v1150_v0  ;;  %v1190_v18 = vadd.f32 %v2835_v8, %v1151_v3  ;;  %v1191_v37 = vadd.f32 %v2835_v8, %v1152_v21  ;;  %v1192_v39 = vadd.f32 %v2835_v8, %v1153_v34  ;;  %v1155_v40 = vld [vmem:[#allocation2 + $0x68] sm:$0xff]  ;;  %v1156_v43 = vld [vmem:[#allocation2 + $0x30] sm:$0xff]  ;;  %v1158_v52 = vld [vmem:[#allocation2 + $0x80] sm:$0xff] }
 0x301   : > { %v1193_v42 = vadd.f32 %v2835_v8, %v1154_v36  ;;  %v1157_v47 = vld [vmem:[#allocation2 + $0x48] sm:$0xff]  ;;  %v1194_v45 = vadd.f32 %v2835_v8, %v1155_v40  ;;  %v1195_v51 = vadd.f32 %v2835_v8, %v1156_v43  ;;  %v1197_v5 = vadd.f32 %v2835_v8, %v1158_v52  ;;  %v1161_v58 = vld [vmem:[#allocation2 + $0xb8] sm:$0xff]  ;;  %v1162_v61 = vld [vmem:[#allocation2 + $0x60] sm:$0xff] }
 0x302   : > { %v1666_v48 = vpack.c.bf16 %v1190_v18, %v1189_v13  ;;  %v1196_v57 = vadd.f32 %v2835_v8, %v1157_v47  ;;  %v1159_v53 = vld [vmem:[#allocation2 + $0x88] sm:$0xff]  ;;  %v1671_v63 = vpack.c.bf16 %v1192_v39, %v1191_v37  ;;  %v1163_v44 = vld [vmem:[#allocation2 + $0xf0] sm:$0xff]  ;;  %v1200_v1 = vadd.f32 %v2835_v8, %v1161_v58  ;;  %v1165_v50 = vld [vmem:[#allocation2 + $0x78] sm:$0xff] }
 0x303   : > { %v1160_v55 = vld [vmem:[#allocation2 + $0xe8] sm:$0xff]  ;;  %v1198_v11 = vadd.f32 %v2835_v8, %v1159_v53  ;;  %v1676_v17 = vpack.c.bf16 %v1194_v45, %v1193_v42  ;;  %v1201_v2 = vadd.f32 %v2835_v8, %v1162_v61  ;;  %v1166_v56 = vld [vmem:[#allocation2 + $0x38] sm:$0xff]  ;;  %v1202_v7 = vadd.f32 %v2835_v8, %v1163_v44  ;;  %v1168_v10 = vld [vmem:[#allocation2 + $0x40] sm:$0xff] }
 0x304   : > { %v1199_v60 = vadd.f32 %v2835_v8, %v1160_v55  ;;  %1667 = vst [vmem:[%s2796_s18] sm:$0xff] %v1666_v48   ;;  %v1681_v23 = vpack.c.bf16 %v1196_v57, %v1195_v51  ;;  %v1164_v6 = vld [vmem:[#allocation2 + $0x8] sm:$0xff]  ;;  %1743 = vst [vmem:[%s2796_s18 + $0x8] sm:$0xff] %v1671_v63   ;;  %v1204_v12 = vadd.f32 %v2835_v8, %v1165_v50  ;;  %v1167_v4 = vld [vmem:[#allocation2 + $0x58] sm:$0xff] }
 0x305   : > { %v1686_v62 = vpack.c.bf16 %v1198_v11, %v1197_v5  ;;  %v1203_v9 = vadd.f32 %v2835_v8, %v1164_v6  ;;  %v1169_v16 = vld [vmem:[#allocation2 + $0xc8] sm:$0xff]  ;;  %1744 = vst [vmem:[%s2796_s18 + $0x10] sm:$0xff] %v1676_v17   ;;  %v1205_v15 = vadd.f32 %v2835_v8, %v1166_v56  ;;  %v1206_v19 = vadd.f32 %v2835_v8, %v1167_v4  ;;  %v1170_v26 = vld [vmem:[#allocation2 + $0xe0] sm:$0xff]  ;;  %v1171_v29 = vld [vmem:[#allocation2 + $0x90] sm:$0xff] }
 0x306   : > { %1745 = vst [vmem:[%s2796_s18 + $0x18] sm:$0xff] %v1681_v23   ;;  %v1691_v14 = vpack.c.bf16 %v1200_v1, %v1199_v60  ;;  %v1207_v22 = vadd.f32 %v2835_v8, %v1168_v10  ;;  %v1172_v20 = vld [vmem:[#allocation2 + $0x70] sm:$0xff]  ;;  %v1696_v24 = vpack.c.bf16 %v1202_v7, %v1201_v2  ;;  %v1208_v32 = vadd.f32 %v2835_v8, %v1169_v16  ;;  %v1173_v38 = vld [vmem:[#allocation2 + $0xc0] sm:$0xff]  ;;  %v1174_v27 = vld [vmem:[#allocation2 + $0xa8] sm:$0xff] }
 0x307   : > { %1746 = vst [vmem:[%s2796_s18 + $0x20] sm:$0xff] %v1686_v62   ;;  %v1701_v25 = vpack.c.bf16 %v1204_v12, %v1203_v9  ;;  %v1209_v35 = vadd.f32 %v2835_v8, %v1170_v26  ;;  %v1175_v28 = vld [vmem:[#allocation2 + $0xd0] sm:$0xff]  ;;  %v1706_v30 = vpack.c.bf16 %v1206_v19, %v1205_v15  ;;  %v1210_v41 = vadd.f32 %v2835_v8, %v1171_v29  ;;  %v1177_v33 = vld [vmem:[#allocation2 + $0x28] sm:$0xff]  ;;  %v1178_v54 = vld [vmem:[#allocation2 + $0xa0] sm:$0xff] }
 0x308   : > { %1747 = vst [vmem:[%s2796_s18 + $0x28] sm:$0xff] %v1691_v14   ;;  %v1211_v46 = vadd.f32 %v2835_v8, %v1172_v20  ;;  %v1212_v49 = vadd.f32 %v2835_v8, %v1173_v38  ;;  %v1176_v31 = vld [vmem:[#allocation2 + $0x10] sm:$0xff]  ;;  %1748 = vst [vmem:[%s2796_s18 + $0x30] sm:$0xff] %v1696_v24   ;;  %v1711_v59 = vpack.c.bf16 %v1208_v32, %v1207_v22  ;;  %v1179_v18 = vld [vmem:[#allocation2 + $0xf8] sm:$0xff] }
 0x309   : > { %1749 = vst [vmem:[%s2796_s18 + $0x38] sm:$0xff] %v1701_v25   ;;  %v1213_v0 = vadd.f32 %v2835_v8, %v1174_v27  ;;  %v1214_v3 = vadd.f32 %v2835_v8, %v1175_v28  ;;  %v1215_v13 = vadd.f32 %v2835_v8, %v1176_v31  ;;  %v1180_v21 = vld [vmem:[#allocation2 + $0x20] sm:$0xff]  ;;  %v1181_v34 = vld [vmem:[#allocation2 + $0x98] sm:$0xff]  ;;  %1750 = vst [vmem:[%s2796_s18 + $0x40] sm:$0xff] %v1706_v30  }
 0x30a   : > { %v1716_v36 = vpack.c.bf16 %v1210_v41, %v1209_v35  ;;  %v1721_v37 = vpack.c.bf16 %v1212_v49, %v1211_v46  ;;  %v1216_v39 = vadd.f32 %v2835_v8, %v1177_v33  ;;  %v1217_v40 = vadd.f32 %v2835_v8, %v1178_v54  ;;  %1751 = vst [vmem:[%s2796_s18 + $0x48] sm:$0xff] %v1711_v59  }
 0x30b   : > { %v1726_v42 = vpack.c.bf16 %v1214_v3, %v1213_v0  ;;  %v1218_v43 = vadd.f32 %v2835_v8, %v1179_v18  ;;  %v1219_v47 = vadd.f32 %v2835_v8, %v1180_v21  ;;  %v1220_v48 = vadd.f32 %v2835_v8, %v1181_v34 }
 0x30c   : > { %1752 = vst [vmem:[%s2796_s18 + $0x50] sm:$0xff] %v1716_v36   ;;  %1753 = vst [vmem:[%s2796_s18 + $0x58] sm:$0xff] %v1721_v37   ;;  %v1731_v45 = vpack.c.bf16 %v1216_v39, %v1215_v13 }
 0x30d   : > { %1754 = vst [vmem:[%s2796_s18 + $0x60] sm:$0xff] %v1726_v42   ;;  %v1736_v51 = vpack.c.bf16 %v1218_v43, %v1217_v40  ;;  %v1741_v57 = vpack.c.bf16 %v1220_v48, %v1219_v47 }
 0x30e   : > { %1755 = vst [vmem:[%s2796_s18 + $0x68] sm:$0xff] %v1731_v45  }
 0x30f   : > { %1756 = vst [vmem:[%s2796_s18 + $0x70] sm:$0xff] %v1736_v51   ;;  %1757 = vst [vmem:[%s2796_s18 + $0x78] sm:$0xff] %v1741_v57  }
 0x310 PF: > { %s3036_s11 = sld [smem:[#allocation17_spill]]  ;;  %s1395_s10 = sshll.u32 %s2796_s18, 4  ;;  %s2892_s10 = int_to_ptr.vmem [resolvable:$true] %s1395_s10 }
 0x311   : > { %s3038_s30 = sld [smem:[#allocation21_spill]]  ;;  %s2896_s24 = scalar_lea.sflag [#allocation5], %s284_s9 }
 0x312   : > { %s3039_s13 = sld [smem:[#allocation28_spill]]  ;;  %s2262_s6 = scalar_lea.vmem %s2892_s10, 2048 }
 0x313   : > { %p2263_p10 = scmp.ne.s32.totalorder %s2892_s10, %s2262_s6  ;;  %s2425_s14 = smov [#allocation9]  }
 0x314   : > { %s2266_s16 = sshll.u32 %s2425_s14, 4  ;;  %s2267_s16 = int_to_ptr.vmem [resolvable:$false] %s2266_s16 }
 0x315   : > { %s2268_s0 = scalar_lea.vmem %s2267_s16, 4096  ;;  %p2269_p9 = scmp.lt.s32.totalorder %s2892_s10, %s2267_s16 }
 0x316   : > { %s1662_s5 = sshll.u32 %s3036_s11, 11  ;;  %p2270_p12 = scmp.lt.s32.totalorder %s2268_s0, %s2262_s6 }
 0x317   : > { %p3040_p0 = scmp.ne.s32.totalorder %s3038_s30, 0 }
 0x318   : > { %s2889_s25 = scalar_lea.hbm %s3039_s13, %s1662_s5  ;;  %p2271_p6 = por %p2270_p12, %p2269_p9 }
 0x319   : > { %p2264_p8 = pnand %p2263_p10, %p3040_p0 }
 0x31b   : > { %p2265_p5 = pneg %p2264_p8 }
 0x31d   : > { %p2272_p7 = pnand %p2271_p6, %p2265_p5 }
 0x31f   : > { %2275 = shalt.err (!%p2272_p7)
}
 0x320   : > { %s2276_s9 = scalar_lea.hbm %s2889_s25, 2048  ;;  %s2280_s7 = scalar_lea.hbm %s3039_s13, 4096 }
 0x321   : > { %p2277_p4 = scmp.ne.s32.totalorder %s2889_s25, %s2276_s9  ;;  %p2281_p11 = scmp.lt.s32.totalorder %s2889_s25, %s3039_s13 }
 0x322   : > { %p2282_p3 = scmp.lt.s32.totalorder %s2280_s7, %s2276_s9 }
 0x323   : > { %p2278_p13 = pnand %p2277_p4, %p3040_p0 }
 0x324   : > { %p2283_p2 = por %p2282_p3, %p2281_p11 }
 0x325   : > { %p2279_p1 = pneg %p2278_p13 }
 0x327   : > { %p2284_p10 = pnand %p2283_p2, %p2279_p1 }
 0x329   : > { %2287 = shalt.err (!%p2284_p10)
}
 0x32a   : > { %s2426_s21 = smov 64   ;;  %s2427_s5 = smov 4  }
 0x32b   : > { %1966 = dma.vmem_to_hbm [thread:$0]  (%p3040_p0), %s2892_s10, 2048, %s2889_s25, %s2896_s24, %s2426_s21, %s2426_s21, %s2427_s5  }
 0x32c PF: > { %s3041_s2 = sld [smem:[#allocation14_spill]]  ;;  %p1986_p8 = scmp.ge.s32.totalorder %s2414_s28, 2 }
 0x32d   : > { %s3042_s3 = sld [smem:[#allocation22_spill]] }
 0x332   : > { %s1410_s6 = sand.u32 1, %s3041_s2  }
 0x333   : > { %p3043_p5 = scmp.ne.s32.totalorder %s3042_s3, 0  ;;  %s1411_s14 = scalar_lea.sflag [#allocation5], %s1410_s6 }
 0x335   : > { %p1980_p9 = pnand %p1986_p8, %p3043_p5 }
 0x337   : > { %p1981_p12 = pneg %p1980_p9 }
 0x339   : > { %2357 = dma.done.wait (%p1981_p12), %s1411_s14, 2048  }
 0x33a   : > { %2359 = vsyncadd (%p1981_p12), %s1411_s14, 4294965248  ;;  %s23_s28 = sadd.s32 1, %s2414_s28   ;;  %s3045_s30 = sld [smem:[#allocation15_spill]] }
 0x33b   : > { %p2924_p6 = scmp.ge.s32.totalorder %s23_s28, 6   ;;  %s3046_s25 = smov %s2599_s15 }
 0x33c   : > { %s3047_s10 = sld [smem:[#allocation23_spill]]  ;;  %s3051_s16 = smov %s2370_s17 }
 0x33d   : > { %s3048_s0 = sld [smem:[#allocation24_spill]]  ;;  %s3052_s17 = smov %s3046_s25 }
 0x33e   : > { %s3053_s18 = smov %s2378_s19  ;;  %s3054_s19 = smov %s2382_s20 }
 0x33f   : > { %s3055_s20 = smov %s2627_s12  ;;  %s3056_s21 = smov %s2390_s22 }
 0x340   : > { %s3050_s15 = smov %s3045_s30  ;;  %s3057_s22 = smov %s2394_s23 }
 0x341   : > { %s3058_s23 = smov %s2602_s4  ;;  %s3059_s24 = smov %s2406_s26 }
 0x342   : > { %s3060_s25 = smov %s2410_s27  ;;  %s3061_s26 = smov %s3047_s10 }
 0x343   : > { %s3062_s27 = smov %s3048_s0  ;;  %22 = sbr.rel (!%p2924_p6) target bundleno = 17 (0x11), region = 106 }
 0x348   :  { %1416 = vsyncpa [#allocation4], 1 }
 0x349   :  { %1418 = vsyncpa [#allocation4 + $0x1], 1 }
 0x34a   :  { %1419 = vsyncpa [#allocation7], 1 }
 0x34b   :  { %1421 = vsyncpa [#allocation7 + $0x1], 1 }
 0x34c   :  { %1422 = vsyncpa [#allocation5], 1 }
 0x34d   :  { %1424 = vsyncpa [#allocation5 + $0x1], 1 }

</bundles_post_ra>
